<compile_context>
chip_gen: v7x
topology: tpu7x:2x2x1
jax: 0.10.0
libtpu: 0.0.40
codegen_flags: <defaults>
</compile_context>

<pallas_src>
import functools

import jax
import jax.numpy as jnp
from jax import lax
from jax.experimental import pallas as pl
from jax.experimental.pallas import tpu as pltpu

_LANES = 128
_SUBLANES = 8


def _sublane_multiple(dtype):
    itemsize = jnp.dtype(dtype).itemsize
    return _SUBLANES * max(1, 4 // itemsize)


def _largest_divisor_leq(n, cap):
    cap = max(1, min(n, cap))
    for d in range(cap, 0, -1):
        if n % d == 0:
            return d
    return 1


def _round_up(x, m):
    return -(-x // m) * m


def _dice_sums_kernel(pred_ref, targ_ref, sp_ref, st_ref, spt_ref, *,
                      tile_b, tile_r, sub_r, rows_total, chunks_per_group,
                      needs_mask):
    """Per-(group, batch-block) partial sums of sigmoid(p), t and sigmoid(p)*t."""
    gi = pl.program_id(0)       # optional split of the feature sweep
    j = pl.program_id(2)        # reduction axis (feature-row chunks), last

    steps = tile_r // sub_r

    if needs_mask:
        row0 = (gi * chunks_per_group + j) * tile_r   # first feature row of block
        rows_valid = rows_total - row0                # rows of this block in-bounds

    def body(i, carry):
        sp, st, spt = carry
        base = pl.multiple_of(i * sub_r, sub_r)
        p = pred_ref[:, pl.ds(base, sub_r), :].astype(jnp.float32)
        t = targ_ref[:, pl.ds(base, sub_r), :].astype(jnp.float32)
        # sigmoid(x) == 0.5*tanh(0.5*x) + 0.5  -> one EUP push per vreg.
        p = 0.5 * jnp.tanh(0.5 * p) + 0.5
        if needs_mask:
            ridx = base + lax.broadcasted_iota(
                jnp.int32, (p.shape[0], sub_r, _LANES), 1)
            m = ridx < rows_valid
            p = jnp.where(m, p, 0.0)
            t = jnp.where(m, t, 0.0)
        return sp + p, st + t, spt + p * t

    zero = jnp.zeros((tile_b, sub_r, _LANES), jnp.float32)
    unroll = max(1, min(steps, 8 // max(1, tile_b)))
    sp, st, spt = lax.fori_loop(0, steps, body, (zero, zero, zero),
                                unroll=unroll)

    @pl.when(j == 0)
    def _():
        sp_ref[...] = sp
        st_ref[...] = st
        spt_ref[...] = spt

    @pl.when(j > 0)
    def _():
        sp_ref[...] += sp
        st_ref[...] += st
        spt_ref[...] += spt


def dice_loss(pred, target, epsilon=1e-6, block_bytes=4 * 1024 * 1024,
              max_batch_fold=8):
    assert pred.shape == target.shape
    b = pred.shape[0]
    n = 1
    for d in pred.shape[1:]:
        n *= d

    pred2 = pred.reshape(b, n)
    targ2 = target.reshape(b, n)

    # Lane remainder: only pad when N is not a multiple of 128 (rare for CHW).
    # sigmoid(-inf) == 0 exactly under the tanh form, target pad is 0, so the
    # padded elements contribute nothing to any of the sums.
    # TODO(synk): avoid this copy too via 2-D lane masking when N % 128 != 0.
    if n % _LANES != 0:
        n_pad = _round_up(n, _LANES)
        pad = ((0, 0), (0, n_pad - n))
        pred2 = jnp.pad(pred2, pad, constant_values=-jnp.inf)
        targ2 = jnp.pad(targ2, pad)
        n = n_pad

    r = n // _LANES                      # 128-lane feature rows per batch elem
    itemsize_p = jnp.dtype(pred.dtype).itemsize
    itemsize_t = jnp.dtype(target.dtype).itemsize
    row_mult = max(_sublane_multiple(pred.dtype),
                   _sublane_multiple(target.dtype))
    sub_r = row_mult

    # Feature-axis tile from a byte budget (amortizes the ~0.35us/step
    # overhead); last block may be partial and is masked in-kernel.
    budget_rows = max(row_mult,
                      (2 * block_bytes) // (_LANES * (itemsize_p + itemsize_t)))
    budget_rows = (budget_rows // row_mult) * row_mult
    tile_r = min(_round_up(r, row_mult), budget_rows)
    chunks = pl.cdiv(r, tile_r)
    needs_mask = (r % tile_r) != 0

    # Small-N regime: fold several batch rows into one block so each grid step
    # still moves a reasonable DMA.
    if chunks == 1:
        tile_b = _largest_divisor_leq(
            b, min(max_batch_fold, max(1, budget_rows // tile_r)))
    else:
        tile_b = 1
    b_blocks = b // tile_b

    # 2-way split of the feature sweep only when the batch axis cannot feed
    # both v7x TensorCores; it never shrinks tile_r (harmless on 1-TC chips).
    g = 2 if (b_blocks == 1 and chunks >= 4 and chunks % 2 == 0) else 1
    cpg = chunks // g

    pred3 = pred2.reshape(b, r, _LANES)   # free reshape (row-major, N%128==0)
    targ3 = targ2.reshape(b, r, _LANES)

    in_spec = pl.BlockSpec((tile_b, tile_r, _LANES),
                           lambda gi, bi, j: (bi, gi * cpg + j, 0))
    out_spec = pl.BlockSpec((None, tile_b, sub_r, _LANES),
                            lambda gi, bi, j: (gi, bi, 0, 0))
    part_shape = jax.ShapeDtypeStruct((g, b, sub_r, _LANES), jnp.float32)

    kernel = functools.partial(
        _dice_sums_kernel, tile_b=tile_b, tile_r=tile_r, sub_r=sub_r,
        rows_total=r, chunks_per_group=cpg, needs_mask=needs_mask)

    in_bytes_per_step = tile_b * tile_r * _LANES * (itemsize_p + itemsize_t)
    vmem_limit = int(min(56 << 20, max(32 << 20, 3 * in_bytes_per_step)))

    sp, st, spt = pl.pallas_call(
        kernel,
        out_shape=(part_shape, part_shape, part_shape),
        grid_spec=pltpu.PrefetchScalarGridSpec(
            num_scalar_prefetch=0,
            grid=(g, b_blocks, cpg),
            in_specs=[in_spec, in_spec],
            out_specs=[out_spec, out_spec, out_spec],
        ),
        compiler_params=pltpu.CompilerParams(
            dimension_semantics=("parallel", "parallel", "arbitrary"),
            vmem_limit_bytes=vmem_limit),
    )(pred3, targ3)

    # Tiny epilogue: reduce the (G, B, sub_r, 128) lane partials + dice formula.
    sp = jnp.sum(sp, axis=(0, 2, 3))     # [B]
    st = jnp.sum(st, axis=(0, 2, 3))     # [B]
    spt = jnp.sum(spt, axis=(0, 2, 3))   # [B]
    loss = 1.0 - (2.0 * spt + epsilon) / (sp + st + epsilon)
    return jnp.mean(loss)


def _dice_loss_ref(pred, target, epsilon=1e-6):
    b = pred.shape[0]
    p = jax.nn.sigmoid(pred).reshape(b, -1)
    t = target.reshape(b, -1)
    numerator = 2.0 * jnp.sum(p * t, axis=1)
    denominator = jnp.sum(p, axis=-1) + jnp.sum(t, axis=-1)
    loss = 1.0 - (numerator + epsilon) / (denominator + epsilon)
    return jnp.mean(loss)


if __name__ == "__main__":
    key = jax.random.PRNGKey(0)
    k1, k2 = jax.random.split(key)
    # NCHW, small shapes: batch=2, channels=4, spatial=16x16
    pred = jax.random.normal(k1, (2, 4, 16, 16), dtype=jnp.float32)
    target = (jax.random.uniform(k2, (2, 4, 16, 16)) > 0.5).astype(jnp.float32)

    out = jax.jit(dice_loss)(pred, target)
    jax.block_until_ready(out)

    ref = _dice_loss_ref(pred, target)
    assert jnp.allclose(out, ref, atol=1e-5, rtol=1e-5), (out, ref)
    print("KERNEL_OK")
</pallas_src>

<mosaic_0001>
module attributes {stable_mosaic.version = 11 : i64} {
  func.func @_dice_sums_kernel(%arg0: i32, %arg1: i32, %arg2: i32, %arg3: memref<2x8x128xf32, #tpu.memory_space<vmem>>, %arg4: memref<2x8x128xf32, #tpu.memory_space<vmem>>, %arg5: memref<1x2x8x128xf32, #tpu.memory_space<vmem>>, %arg6: memref<1x2x8x128xf32, #tpu.memory_space<vmem>>, %arg7: memref<1x2x8x128xf32, #tpu.memory_space<vmem>>) attributes {dimension_semantics = [#tpu.dimension_semantics<parallel>, #tpu.dimension_semantics<parallel>, #tpu.dimension_semantics<arbitrary>], iteration_bounds = array<i64: 1, 1, 1>, scalar_prefetch = 0 : i64, scratch_operands = 0 : i64, tpu.core_type = #tpu.core_type<tc>, window_params = [{transform_indices = @transform_0, window_bounds = array<i64: 2, 8, 128>}, {transform_indices = @transform_1, window_bounds = array<i64: 2, 8, 128>}, {transform_indices = @transform_2, window_bounds = array<i64: 1, 2, 8, 128>}, {transform_indices = @transform_3, window_bounds = array<i64: 1, 2, 8, 128>}, {transform_indices = @transform_4, window_bounds = array<i64: 1, 2, 8, 128>}]} {
    %cst = arith.constant 0.000000e+00 : f32
    %0 = vector.broadcast %cst : f32 to vector<2x8x128xf32>
    %c0_i32 = arith.constant 0 : i32
    %c8_i32 = arith.constant 8 : i32
    %1 = arith.muli %c0_i32, %c8_i32 : i32
    %2 = tpu.assume_multiple %1, 8 : i32
    %c0 = arith.constant 0 : index
    %3 = arith.index_cast %2 : i32 to index
    %c0_0 = arith.constant 0 : index
    %4 = vector.load %arg3[%c0, %3, %c0_0] : memref<2x8x128xf32, #tpu.memory_space<vmem>>, vector<2x8x128xf32>
    %c0_1 = arith.constant 0 : index
    %5 = arith.index_cast %2 : i32 to index
    %c0_2 = arith.constant 0 : index
    %6 = vector.load %arg4[%c0_1, %5, %c0_2] : memref<2x8x128xf32, #tpu.memory_space<vmem>>, vector<2x8x128xf32>
    %cst_3 = arith.constant 5.000000e-01 : f32
    %7 = vector.broadcast %cst_3 : f32 to vector<2x8x128xf32>
    %8 = arith.mulf %7, %4 : vector<2x8x128xf32>
    %9 = math.tanh %8 : vector<2x8x128xf32>
    %cst_4 = arith.constant 5.000000e-01 : f32
    %10 = vector.broadcast %cst_4 : f32 to vector<2x8x128xf32>
    %11 = arith.mulf %10, %9 : vector<2x8x128xf32>
    %cst_5 = arith.constant 5.000000e-01 : f32
    %12 = vector.broadcast %cst_5 : f32 to vector<2x8x128xf32>
    %13 = arith.addf %11, %12 : vector<2x8x128xf32>
    %14 = arith.addf %0, %13 : vector<2x8x128xf32>
    %15 = arith.addf %0, %6 : vector<2x8x128xf32>
    %16 = arith.mulf %13, %6 : vector<2x8x128xf32>
    %17 = arith.addf %0, %16 : vector<2x8x128xf32>
    %c1_i32 = arith.constant 1 : i32
    %c0_i32_6 = arith.constant 0 : i32
    %18 = arith.cmpi eq, %arg2, %c0_i32_6 : i32
    %19 = arith.extui %18 : i1 to i32
    %c0_i32_7 = arith.constant 0 : i32
    %20 = arith.cmpi ne, %19, %c0_i32_7 : i32
    scf.if %20 {
      %c0_10 = arith.constant 0 : index
      %c0_11 = arith.constant 0 : index
      %c0_12 = arith.constant 0 : index
      %c0_13 = arith.constant 0 : index
      %24 = vector.load %arg5[%c0_10, %c0_11, %c0_12, %c0_13] : memref<1x2x8x128xf32, #tpu.memory_space<vmem>>, vector<1x2x8x128xf32>
      %25 = vector.shape_cast %24 : vector<1x2x8x128xf32> to vector<2x8x128xf32>
      %26 = vector.shape_cast %14 : vector<2x8x128xf32> to vector<1x2x8x128xf32>
      tpu.vector_store %arg5[%c0_10, %c0_11, %c0_12, %c0_13], %26 {strides = array<i32>} : memref<1x2x8x128xf32, #tpu.memory_space<vmem>>, vector<1x2x8x128xf32>,
      %c0_14 = arith.constant 0 : index
      %c0_15 = arith.constant 0 : index
      %c0_16 = arith.constant 0 : index
      %c0_17 = arith.constant 0 : index
      %27 = vector.load %arg6[%c0_14, %c0_15, %c0_16, %c0_17] : memref<1x2x8x128xf32, #tpu.memory_space<vmem>>, vector<1x2x8x128xf32>
      %28 = vector.shape_cast %27 : vector<1x2x8x128xf32> to vector<2x8x128xf32>
      %29 = vector.shape_cast %15 : vector<2x8x128xf32> to vector<1x2x8x128xf32>
      tpu.vector_store %arg6[%c0_14, %c0_15, %c0_16, %c0_17], %29 {strides = array<i32>} : memref<1x2x8x128xf32, #tpu.memory_space<vmem>>, vector<1x2x8x128xf32>,
      %c0_18 = arith.constant 0 : index
      %c0_19 = arith.constant 0 : index
      %c0_20 = arith.constant 0 : index
      %c0_21 = arith.constant 0 : index
      %30 = vector.load %arg7[%c0_18, %c0_19, %c0_20, %c0_21] : memref<1x2x8x128xf32, #tpu.memory_space<vmem>>, vector<1x2x8x128xf32>
      %31 = vector.shape_cast %30 : vector<1x2x8x128xf32> to vector<2x8x128xf32>
      %32 = vector.shape_cast %17 : vector<2x8x128xf32> to vector<1x2x8x128xf32>
      tpu.vector_store %arg7[%c0_18, %c0_19, %c0_20, %c0_21], %32 {strides = array<i32>} : memref<1x2x8x128xf32, #tpu.memory_space<vmem>>, vector<1x2x8x128xf32>,
    } else {
    }
    %c0_i32_8 = arith.constant 0 : i32
    %21 = arith.cmpi sgt, %arg2, %c0_i32_8 : i32
    %22 = arith.extui %21 : i1 to i32
    %c0_i32_9 = arith.constant 0 : i32
    %23 = arith.cmpi ne, %22, %c0_i32_9 : i32
    scf.if %23 {
      %c0_10 = arith.constant 0 : index
      %c0_11 = arith.constant 0 : index
      %c0_12 = arith.constant 0 : index
      %c0_13 = arith.constant 0 : index
      %24 = vector.load %arg5[%c0_10, %c0_11, %c0_12, %c0_13] : memref<1x2x8x128xf32, #tpu.memory_space<vmem>>, vector<1x2x8x128xf32>
      %25 = vector.shape_cast %24 : vector<1x2x8x128xf32> to vector<2x8x128xf32>
      %26 = arith.addf %25, %14 : vector<2x8x128xf32>
      %c0_14 = arith.constant 0 : index
      %c0_15 = arith.constant 0 : index
      %c0_16 = arith.constant 0 : index
      %c0_17 = arith.constant 0 : index
      %27 = vector.load %arg5[%c0_14, %c0_15, %c0_16, %c0_17] : memref<1x2x8x128xf32, #tpu.memory_space<vmem>>, vector<1x2x8x128xf32>
      %28 = vector.shape_cast %27 : vector<1x2x8x128xf32> to vector<2x8x128xf32>
      %29 = vector.shape_cast %26 : vector<2x8x128xf32> to vector<1x2x8x128xf32>
      tpu.vector_store %arg5[%c0_14, %c0_15, %c0_16, %c0_17], %29 {strides = array<i32>} : memref<1x2x8x128xf32, #tpu.memory_space<vmem>>, vector<1x2x8x128xf32>,
      %c0_18 = arith.constant 0 : index
      %c0_19 = arith.constant 0 : index
      %c0_20 = arith.constant 0 : index
      %c0_21 = arith.constant 0 : index
      %30 = vector.load %arg6[%c0_18, %c0_19, %c0_20, %c0_21] : memref<1x2x8x128xf32, #tpu.memory_space<vmem>>, vector<1x2x8x128xf32>
      %31 = vector.shape_cast %30 : vector<1x2x8x128xf32> to vector<2x8x128xf32>
      %32 = arith.addf %31, %15 : vector<2x8x128xf32>
      %c0_22 = arith.constant 0 : index
      %c0_23 = arith.constant 0 : index
      %c0_24 = arith.constant 0 : index
      %c0_25 = arith.constant 0 : index
      %33 = vector.load %arg6[%c0_22, %c0_23, %c0_24, %c0_25] : memref<1x2x8x128xf32, #tpu.memory_space<vmem>>, vector<1x2x8x128xf32>
      %34 = vector.shape_cast %33 : vector<1x2x8x128xf32> to vector<2x8x128xf32>
      %35 = vector.shape_cast %32 : vector<2x8x128xf32> to vector<1x2x8x128xf32>
      tpu.vector_store %arg6[%c0_22, %c0_23, %c0_24, %c0_25], %35 {strides = array<i32>} : memref<1x2x8x128xf32, #tpu.memory_space<vmem>>, vector<1x2x8x128xf32>,
      %c0_26 = arith.constant 0 : index
      %c0_27 = arith.constant 0 : index
      %c0_28 = arith.constant 0 : index
      %c0_29 = arith.constant 0 : index
      %36 = vector.load %arg7[%c0_26, %c0_27, %c0_28, %c0_29] : memref<1x2x8x128xf32, #tpu.memory_space<vmem>>, vector<1x2x8x128xf32>
      %37 = vector.shape_cast %36 : vector<1x2x8x128xf32> to vector<2x8x128xf32>
      %38 = arith.addf %37, %17 : vector<2x8x128xf32>
      %c0_30 = arith.constant 0 : index
      %c0_31 = arith.constant 0 : index
      %c0_32 = arith.constant 0 : index
      %c0_33 = arith.constant 0 : index
      %39 = vector.load %arg7[%c0_30, %c0_31, %c0_32, %c0_33] : memref<1x2x8x128xf32, #tpu.memory_space<vmem>>, vector<1x2x8x128xf32>
      %40 = vector.shape_cast %39 : vector<1x2x8x128xf32> to vector<2x8x128xf32>
      %41 = vector.shape_cast %38 : vector<2x8x128xf32> to vector<1x2x8x128xf32>
      tpu.vector_store %arg7[%c0_30, %c0_31, %c0_32, %c0_33], %41 {strides = array<i32>} : memref<1x2x8x128xf32, #tpu.memory_space<vmem>>, vector<1x2x8x128xf32>,
    } else {
    }
    return
  }
  func.func @transform_0(%arg0: i32, %arg1: i32, %arg2: i32) -> (i32, i32, i32) {
    %c1_i32 = arith.constant 1 : i32
    %0 = arith.muli %arg0, %c1_i32 : i32
    %1 = arith.addi %0, %arg2 : i32
    %c0_i32 = arith.constant 0 : i32
    %c0_i32_0 = arith.constant 0 : i32
    return %arg1, %1, %c0_i32 : i32, i32, i32
  }
  func.func @transform_1(%arg0: i32, %arg1: i32, %arg2: i32) -> (i32, i32, i32) {
    %c1_i32 = arith.constant 1 : i32
    %0 = arith.muli %arg0, %c1_i32 : i32
    %1 = arith.addi %0, %arg2 : i32
    %c0_i32 = arith.constant 0 : i32
    %c0_i32_0 = arith.constant 0 : i32
    return %arg1, %1, %c0_i32 : i32, i32, i32
  }
  func.func @transform_2(%arg0: i32, %arg1: i32, %arg2: i32) -> (i32, i32, i32, i32) {
    %c0_i32 = arith.constant 0 : i32
    %c0_i32_0 = arith.constant 0 : i32
    %c0_i32_1 = arith.constant 0 : i32
    return %arg0, %arg1, %c0_i32, %c0_i32_0 : i32, i32, i32, i32
  }
  func.func @transform_3(%arg0: i32, %arg1: i32, %arg2: i32) -> (i32, i32, i32, i32) {
    %c0_i32 = arith.constant 0 : i32
    %c0_i32_0 = arith.constant 0 : i32
    %c0_i32_1 = arith.constant 0 : i32
    return %arg0, %arg1, %c0_i32, %c0_i32_0 : i32, i32, i32, i32
  }
  func.func @transform_4(%arg0: i32, %arg1: i32, %arg2: i32) -> (i32, i32, i32, i32) {
    %c0_i32 = arith.constant 0 : i32
    %c0_i32_0 = arith.constant 0 : i32
    %c0_i32_1 = arith.constant 0 : i32
    return %arg0, %arg1, %c0_i32, %c0_i32_0 : i32, i32, i32, i32
  }
}

</mosaic_0001>

<bundles_post_ra>
// kernel: dice_loss.1
= control target key start
LH: loop header
LB: loop body
LE: loop exit
PB: predicated region body
PF: predicated region fallthrough
CT: control target
= control target key end

     0   :  { %s183_s0 = inlined_call_operand.vmem [shape: f32[2,8,128], index: 0, kind: input, shape index: {}]   ;;  %s184_s1 = inlined_call_operand.vmem [shape: f32[2,8,128], index: 1, kind: input, shape index: {}]   ;;  %s185_s3 = inlined_call_operand.vmem [shape: f32[1,2,8,128], index: 3, kind: output, shape index: {1}]   ;;  %s186_s2 = inlined_call_operand.vmem [shape: f32[1,2,8,128], index: 2, kind: output, shape index: {0}]   ;;  %s187_s4 = inlined_call_operand.vmem [shape: f32[1,2,8,128], index: 4, kind: output, shape index: {2}]  }
   0x1   :  { %v48_v0 = vld [vmem:[%s183_s0] sm:$0xff]  ;;  %v49_v1 = vld [vmem:[%s183_s0 + $0x8] sm:$0xff] }
   0x2   :  { %v50_v2 = vld [vmem:[%s184_s1] sm:$0xff]  ;;  %v52_v3 = vmul.f32 0.5, %v48_v0  ;;  %v53_v4 = vmul.f32 0.5, %v49_v1  ;;  %v51_v5 = vld [vmem:[%s184_s1 + $0x8] sm:$0xff] }
   0x3   :  { %74 = vst [vmem:[%s185_s3] sm:$0xff] %v50_v2  ;;  %75 = vst [vmem:[%s185_s3 + $0x8] sm:$0xff] %v51_v5 }
   0x4   :  { %124 = vtanh.f32 %v52_v3 }
   0x5   :  { %126 = vtanh.f32 %v53_v4 }
   0xe   :  { %v125_v6 = vpop.eup %124 }
   0xf   :  { %v127_v7 = vpop.eup %126  ;;  %v56_v8 = vmul.f32 0.5, %v125_v6 }
  0x10   :  { %v57_v9 = vmul.f32 0.5, %v127_v7 }
  0x11   :  { %v58_v10 = vadd.f32 0.5, %v56_v8 }
  0x12   :  { %v59_v11 = vadd.f32 0.5, %v57_v9 }
  0x13   :  { %72 = vst [vmem:[%s186_s2] sm:$0xff] %v58_v10  ;;  %v64_v12 = vmul.f32 %v58_v10, %v50_v2 }
  0x14   :  { %73 = vst [vmem:[%s186_s2 + $0x8] sm:$0xff] %v59_v11  ;;  %v65_v13 = vmul.f32 %v59_v11, %v51_v5 }
  0x15   :  { %76 = vst [vmem:[%s187_s4] sm:$0xff] %v64_v12 }
  0x16   :  { %77 = vst [vmem:[%s187_s4 + $0x8] sm:$0xff] %v65_v13 }

</bundles_post_ra>
